<compile_context>
chip_gen: v7x
topology: tpu7x:2x2x1
jax: 0.10.0
libtpu: 0.0.40
codegen_flags: <defaults>
</compile_context>

<pallas_src>
import jax
import jax.numpy as jnp
from jax.experimental import pallas as pl
from jax.experimental.pallas import tpu as pltpu

_MIB = 1024 * 1024


def _vmem_capacity_bytes():
    try:
        return int(pltpu.get_tpu_info().vmem_capacity_bytes)
    except Exception:
        return 64 * _MIB  # conservative fallback: v7x per-TC VMEM


def _tree_sum(terms):
    # Pairwise reduction: shortens the dependent-add chain from O(n) to
    # O(log n) (no f32 FMA on v5e/v6e, so dependent vadds are the chain).
    while len(terms) > 1:
        nxt = [terms[i] + terms[i + 1] for i in range(0, len(terms) - 1, 2)]
        if len(terms) % 2:
            nxt.append(terms[-1])
        terms = nxt
    return terms[0]


def _decoder_kernel_2d(w_ref, x_ref, o_ref):
    # w_ref: (Cout, Cin) f32 in SMEM (scalar reads)
    # x_ref: (tile_m, Cin*HW) VMEM, lane-dense
    # o_ref: (tile_m, Cout*HW) VMEM, lane-dense
    cout, cin = w_ref.shape
    hw = x_ref.shape[1] // cin
    for o in range(cout):  # Cout == 1 for this decoder config
        prods = [x_ref[:, c * hw:(c + 1) * hw].astype(jnp.float32) * w_ref[o, c]
                 for c in range(cin)]
        acc = _tree_sum(prods)
        # jax.nn.sigmoid lowers to the EUP logistic path (exp + reciprocal),
        # keeping VALU slots free for the channel-reduction adds.
        o_ref[:, o * hw:(o + 1) * hw] = jax.nn.sigmoid(acc).astype(o_ref.dtype)


def _decoder_kernel_3d(w_ref, x_ref, o_ref):
    # Fallback layout when HW is not lane-aligned (HW % 128 != 0).
    # x_ref: (tile_m, Cin, HW); o_ref: (tile_m, Cout, HW)
    cout, cin = w_ref.shape
    for o in range(cout):
        prods = [x_ref[:, c, :].astype(jnp.float32) * w_ref[o, c]
                 for c in range(cin)]
        acc = _tree_sum(prods)
        o_ref[:, o, :] = jax.nn.sigmoid(acc).astype(o_ref.dtype)


def decoder_forward(encoder_outputs, weight, *, block_bytes=None):
    """Pallas equivalent of Decoder.forward for
    config.decoder = [('conv', 'sigmoid', 16, 1, 1, 0, 1)].

    encoder_outputs: list of arrays; only the last (B, S, Cin, H, W) entry is
      used (the single-'conv' decoder only touches encoder_outputs[-1]).
    weight: (Cout, Cin) — the 1x1 Conv2d weight with kernel dims squeezed.
    """
    x = encoder_outputs[-1]
    B, S, C, H, W = x.shape
    Cout, Cin = weight.shape
    assert Cin == C, (Cin, C)

    M = B * S
    HW = H * W
    itemsize = x.dtype.itemsize

    # ---- block sizing derived from the chip's VMEM, not hardcoded ---------
    vmem_cap = _vmem_capacity_bytes()
    usable = max(16 * _MIB, vmem_cap - 16 * _MIB)  # headroom for internals
    if block_bytes is None:
        # ~16 MiB input blocks amortize the ~0.35 us/step pipeline overhead
        # even at v7x's 3.2 TB/s, while 2x(in+out) double-buffers still fit
        # comfortably within v7x's 64 MiB VMEM (and trivially within 128 MiB).
        block_bytes = min(16 * _MIB, usable // 3)

    per_m_bytes = C * HW * itemsize
    tile_m_cap = max(1, block_bytes // per_m_bytes)
    if M >= 16:
        # Keep >= 2 grid steps so the "parallel" axis can shard across the two
        # v7x TensorCores (costs only ~0.35 us on single-TC chips).
        tile_m_cap = min(tile_m_cap, pl.cdiv(M, 2))
    if tile_m_cap >= M:
        tile_m = M                                  # full-extent dim: always legal
    else:
        tile_m = max(8, (tile_m_cap // 8) * 8)      # sublane-dim (8,128) rule
    grid_m = pl.cdiv(M, tile_m)

    in_block_bytes = tile_m * C * HW * itemsize
    out_block_bytes = tile_m * Cout * HW * itemsize
    vmem_limit = int(min(
        usable,
        max(32 * _MIB, 2 * (in_block_bytes + out_block_bytes) + 8 * _MIB)))

    w32 = weight.reshape(Cout, Cin).astype(jnp.float32)
    cost = pl.CostEstimate(
        flops=2 * M * Cin * Cout * HW,
        transcendentals=M * Cout * HW,
        bytes_accessed=(M * Cin * HW + M * Cout * HW) * itemsize + Cout * Cin * 4,
    )
    cparams = pltpu.CompilerParams(
        dimension_semantics=("parallel",),
        vmem_limit_bytes=vmem_limit,
    )
    w_spec = pl.BlockSpec(memory_space=pltpu.MemorySpace.SMEM)

    if HW % 128 == 0:
        # Lane-dense 2-D path: dense vld for every channel slice, dense vst
        # for the (Cout-squeezed) output.  Free reshapes in/out, no transpose.
        x_flat = x.reshape(M, C * HW)
        out_flat = pl.pallas_call(
            _decoder_kernel_2d,
            out_shape=jax.ShapeDtypeStruct((M, Cout * HW), x.dtype),
            grid_spec=pltpu.PrefetchScalarGridSpec(
                num_scalar_prefetch=0,
                grid=(grid_m,),
                in_specs=[
                    w_spec,
                    pl.BlockSpec((tile_m, C * HW), lambda i: (i, 0)),
                ],
                out_specs=pl.BlockSpec((tile_m, Cout * HW), lambda i: (i, 0)),
            ),
            compiler_params=cparams,
            cost_estimate=cost,
        )(w32, x_flat)
        return out_flat.reshape(B, S, Cout, H, W)

    # TODO(synk): HW not a multiple of 128 (e.g. 110x110 frames) — fall back
    # to the 3-D layout; per-channel reads are sublane-strided there.
    x_flat = x.reshape(M, C, HW)
    out_flat = pl.pallas_call(
        _decoder_kernel_3d,
        out_shape=jax.ShapeDtypeStruct((M, Cout, HW), x.dtype),
        grid_spec=pltpu.PrefetchScalarGridSpec(
            num_scalar_prefetch=0,
            grid=(grid_m,),
            in_specs=[
                w_spec,
                pl.BlockSpec((tile_m, C, HW), lambda i: (i, 0, 0)),
            ],
            out_specs=pl.BlockSpec((tile_m, Cout, HW), lambda i: (i, 0, 0)),
        ),
        compiler_params=cparams,
        cost_estimate=cost,
    )(w32, x_flat)
    return out_flat.reshape(B, S, Cout, H, W)


def decoder_reference(encoder_outputs, weight):
    """Pure-JAX reference matching the PyTorch semantics."""
    x = encoder_outputs[-1]
    y = jnp.einsum("bschw,oc->bsohw", x, weight)
    return jax.nn.sigmoid(y)


if __name__ == "__main__":
    key = jax.random.PRNGKey(0)
    k_x, k_w = jax.random.split(key)

    # Small shapes consistent with the module: encoder's last layer outputs
    # 16 channels; decoder conv maps 16 -> 1 with a 1x1 kernel.
    B, S, C, H, W = 2, 8, 16, 16, 16
    Cout = 1

    x = jax.random.normal(k_x, (B, S, C, H, W), dtype=jnp.float32)
    weight = (jax.random.normal(k_w, (Cout, C), dtype=jnp.float32)
              * (1.0 / jnp.sqrt(C)))

    encoder_outputs = [x]  # Decoder only touches encoder_outputs[-1] here.

    out = decoder_forward(encoder_outputs, weight)
    out = jax.block_until_ready(out)

    ref = decoder_reference(encoder_outputs, weight)
    assert out.shape == (B, S, Cout, H, W), out.shape
    assert jnp.allclose(out, ref, atol=1e-5, rtol=1e-5), "mismatch vs reference"

    print("KERNEL_OK")
</pallas_src>

<mosaic_0001>
module attributes {stable_mosaic.version = 11 : i64} {
  func.func @_decoder_kernel_2d(%arg0: i32, %arg1: memref<1x16xf32, #tpu.memory_space<smem>>, %arg2: memref<8x4096xf32, #tpu.memory_space<vmem>>, %arg3: memref<8x256xf32, #tpu.memory_space<vmem>>) attributes {dimension_semantics = [#tpu.dimension_semantics<parallel>], iteration_bounds = array<i64: 2>, scalar_prefetch = 0 : i64, scratch_operands = 0 : i64, tpu.core_type = #tpu.core_type<tc>, window_params = [{transform_indices = @transform_0, window_bounds = array<i64: 1, 16>}, {transform_indices = @transform_1, window_bounds = array<i64: 8, 4096>}, {transform_indices = @transform_2, window_bounds = array<i64: 8, 256>}]} {
    %c0 = arith.constant 0 : index
    %c0_0 = arith.constant 0 : index
    %0 = vector.load %arg2[%c0, %c0_0] : memref<8x4096xf32, #tpu.memory_space<vmem>>, vector<8x256xf32>
    %c0_1 = arith.constant 0 : index
    %c0_2 = arith.constant 0 : index
    %1 = memref.load %arg1[%c0_1, %c0_2] : memref<1x16xf32, #tpu.memory_space<smem>>
    %2 = vector.broadcast %1 : f32 to vector<8x256xf32>
    %3 = arith.mulf %0, %2 : vector<8x256xf32>
    %c0_3 = arith.constant 0 : index
    %c256 = arith.constant 256 : index
    %4 = vector.load %arg2[%c0_3, %c256] : memref<8x4096xf32, #tpu.memory_space<vmem>>, vector<8x256xf32>
    %c0_4 = arith.constant 0 : index
    %c1 = arith.constant 1 : index
    %5 = memref.load %arg1[%c0_4, %c1] : memref<1x16xf32, #tpu.memory_space<smem>>
    %6 = vector.broadcast %5 : f32 to vector<8x256xf32>
    %7 = arith.mulf %4, %6 : vector<8x256xf32>
    %c0_5 = arith.constant 0 : index
    %c512 = arith.constant 512 : index
    %8 = vector.load %arg2[%c0_5, %c512] : memref<8x4096xf32, #tpu.memory_space<vmem>>, vector<8x256xf32>
    %c0_6 = arith.constant 0 : index
    %c2 = arith.constant 2 : index
    %9 = memref.load %arg1[%c0_6, %c2] : memref<1x16xf32, #tpu.memory_space<smem>>
    %10 = vector.broadcast %9 : f32 to vector<8x256xf32>
    %11 = arith.mulf %8, %10 : vector<8x256xf32>
    %c0_7 = arith.constant 0 : index
    %c768 = arith.constant 768 : index
    %12 = vector.load %arg2[%c0_7, %c768] : memref<8x4096xf32, #tpu.memory_space<vmem>>, vector<8x256xf32>
    %c0_8 = arith.constant 0 : index
    %c3 = arith.constant 3 : index
    %13 = memref.load %arg1[%c0_8, %c3] : memref<1x16xf32, #tpu.memory_space<smem>>
    %14 = vector.broadcast %13 : f32 to vector<8x256xf32>
    %15 = arith.mulf %12, %14 : vector<8x256xf32>
    %c0_9 = arith.constant 0 : index
    %c1024 = arith.constant 1024 : index
    %16 = vector.load %arg2[%c0_9, %c1024] : memref<8x4096xf32, #tpu.memory_space<vmem>>, vector<8x256xf32>
    %c0_10 = arith.constant 0 : index
    %c4 = arith.constant 4 : index
    %17 = memref.load %arg1[%c0_10, %c4] : memref<1x16xf32, #tpu.memory_space<smem>>
    %18 = vector.broadcast %17 : f32 to vector<8x256xf32>
    %19 = arith.mulf %16, %18 : vector<8x256xf32>
    %c0_11 = arith.constant 0 : index
    %c1280 = arith.constant 1280 : index
    %20 = vector.load %arg2[%c0_11, %c1280] : memref<8x4096xf32, #tpu.memory_space<vmem>>, vector<8x256xf32>
    %c0_12 = arith.constant 0 : index
    %c5 = arith.constant 5 : index
    %21 = memref.load %arg1[%c0_12, %c5] : memref<1x16xf32, #tpu.memory_space<smem>>
    %22 = vector.broadcast %21 : f32 to vector<8x256xf32>
    %23 = arith.mulf %20, %22 : vector<8x256xf32>
    %c0_13 = arith.constant 0 : index
    %c1536 = arith.constant 1536 : index
    %24 = vector.load %arg2[%c0_13, %c1536] : memref<8x4096xf32, #tpu.memory_space<vmem>>, vector<8x256xf32>
    %c0_14 = arith.constant 0 : index
    %c6 = arith.constant 6 : index
    %25 = memref.load %arg1[%c0_14, %c6] : memref<1x16xf32, #tpu.memory_space<smem>>
    %26 = vector.broadcast %25 : f32 to vector<8x256xf32>
    %27 = arith.mulf %24, %26 : vector<8x256xf32>
    %c0_15 = arith.constant 0 : index
    %c1792 = arith.constant 1792 : index
    %28 = vector.load %arg2[%c0_15, %c1792] : memref<8x4096xf32, #tpu.memory_space<vmem>>, vector<8x256xf32>
    %c0_16 = arith.constant 0 : index
    %c7 = arith.constant 7 : index
    %29 = memref.load %arg1[%c0_16, %c7] : memref<1x16xf32, #tpu.memory_space<smem>>
    %30 = vector.broadcast %29 : f32 to vector<8x256xf32>
    %31 = arith.mulf %28, %30 : vector<8x256xf32>
    %c0_17 = arith.constant 0 : index
    %c2048 = arith.constant 2048 : index
    %32 = vector.load %arg2[%c0_17, %c2048] : memref<8x4096xf32, #tpu.memory_space<vmem>>, vector<8x256xf32>
    %c0_18 = arith.constant 0 : index
    %c8 = arith.constant 8 : index
    %33 = memref.load %arg1[%c0_18, %c8] : memref<1x16xf32, #tpu.memory_space<smem>>
    %34 = vector.broadcast %33 : f32 to vector<8x256xf32>
    %35 = arith.mulf %32, %34 : vector<8x256xf32>
    %c0_19 = arith.constant 0 : index
    %c2304 = arith.constant 2304 : index
    %36 = vector.load %arg2[%c0_19, %c2304] : memref<8x4096xf32, #tpu.memory_space<vmem>>, vector<8x256xf32>
    %c0_20 = arith.constant 0 : index
    %c9 = arith.constant 9 : index
    %37 = memref.load %arg1[%c0_20, %c9] : memref<1x16xf32, #tpu.memory_space<smem>>
    %38 = vector.broadcast %37 : f32 to vector<8x256xf32>
    %39 = arith.mulf %36, %38 : vector<8x256xf32>
    %c0_21 = arith.constant 0 : index
    %c2560 = arith.constant 2560 : index
    %40 = vector.load %arg2[%c0_21, %c2560] : memref<8x4096xf32, #tpu.memory_space<vmem>>, vector<8x256xf32>
    %c0_22 = arith.constant 0 : index
    %c10 = arith.constant 10 : index
    %41 = memref.load %arg1[%c0_22, %c10] : memref<1x16xf32, #tpu.memory_space<smem>>
    %42 = vector.broadcast %41 : f32 to vector<8x256xf32>
    %43 = arith.mulf %40, %42 : vector<8x256xf32>
    %c0_23 = arith.constant 0 : index
    %c2816 = arith.constant 2816 : index
    %44 = vector.load %arg2[%c0_23, %c2816] : memref<8x4096xf32, #tpu.memory_space<vmem>>, vector<8x256xf32>
    %c0_24 = arith.constant 0 : index
    %c11 = arith.constant 11 : index
    %45 = memref.load %arg1[%c0_24, %c11] : memref<1x16xf32, #tpu.memory_space<smem>>
    %46 = vector.broadcast %45 : f32 to vector<8x256xf32>
    %47 = arith.mulf %44, %46 : vector<8x256xf32>
    %c0_25 = arith.constant 0 : index
    %c3072 = arith.constant 3072 : index
    %48 = vector.load %arg2[%c0_25, %c3072] : memref<8x4096xf32, #tpu.memory_space<vmem>>, vector<8x256xf32>
    %c0_26 = arith.constant 0 : index
    %c12 = arith.constant 12 : index
    %49 = memref.load %arg1[%c0_26, %c12] : memref<1x16xf32, #tpu.memory_space<smem>>
    %50 = vector.broadcast %49 : f32 to vector<8x256xf32>
    %51 = arith.mulf %48, %50 : vector<8x256xf32>
    %c0_27 = arith.constant 0 : index
    %c3328 = arith.constant 3328 : index
    %52 = vector.load %arg2[%c0_27, %c3328] : memref<8x4096xf32, #tpu.memory_space<vmem>>, vector<8x256xf32>
    %c0_28 = arith.constant 0 : index
    %c13 = arith.constant 13 : index
    %53 = memref.load %arg1[%c0_28, %c13] : memref<1x16xf32, #tpu.memory_space<smem>>
    %54 = vector.broadcast %53 : f32 to vector<8x256xf32>
    %55 = arith.mulf %52, %54 : vector<8x256xf32>
    %c0_29 = arith.constant 0 : index
    %c3584 = arith.constant 3584 : index
    %56 = vector.load %arg2[%c0_29, %c3584] : memref<8x4096xf32, #tpu.memory_space<vmem>>, vector<8x256xf32>
    %c0_30 = arith.constant 0 : index
    %c14 = arith.constant 14 : index
    %57 = memref.load %arg1[%c0_30, %c14] : memref<1x16xf32, #tpu.memory_space<smem>>
    %58 = vector.broadcast %57 : f32 to vector<8x256xf32>
    %59 = arith.mulf %56, %58 : vector<8x256xf32>
    %c0_31 = arith.constant 0 : index
    %c3840 = arith.constant 3840 : index
    %60 = vector.load %arg2[%c0_31, %c3840] : memref<8x4096xf32, #tpu.memory_space<vmem>>, vector<8x256xf32>
    %c0_32 = arith.constant 0 : index
    %c15 = arith.constant 15 : index
    %61 = memref.load %arg1[%c0_32, %c15] : memref<1x16xf32, #tpu.memory_space<smem>>
    %62 = vector.broadcast %61 : f32 to vector<8x256xf32>
    %63 = arith.mulf %60, %62 : vector<8x256xf32>
    %64 = arith.addf %3, %7 : vector<8x256xf32>
    %65 = arith.addf %11, %15 : vector<8x256xf32>
    %66 = arith.addf %19, %23 : vector<8x256xf32>
    %67 = arith.addf %27, %31 : vector<8x256xf32>
    %68 = arith.addf %35, %39 : vector<8x256xf32>
    %69 = arith.addf %43, %47 : vector<8x256xf32>
    %70 = arith.addf %51, %55 : vector<8x256xf32>
    %71 = arith.addf %59, %63 : vector<8x256xf32>
    %72 = arith.addf %64, %65 : vector<8x256xf32>
    %73 = arith.addf %66, %67 : vector<8x256xf32>
    %74 = arith.addf %68, %69 : vector<8x256xf32>
    %75 = arith.addf %70, %71 : vector<8x256xf32>
    %76 = arith.addf %72, %73 : vector<8x256xf32>
    %77 = arith.addf %74, %75 : vector<8x256xf32>
    %78 = arith.addf %76, %77 : vector<8x256xf32>
    %79 = arith.negf %78 : vector<8x256xf32>
    %80 = math.exp %79 : vector<8x256xf32>
    %cst = arith.constant 1.000000e+00 : f32
    %81 = vector.broadcast %cst : f32 to vector<8x256xf32>
    %82 = arith.addf %81, %80 : vector<8x256xf32>
    %83 = arith.divf %81, %82 : vector<8x256xf32>
    %c0_33 = arith.constant 0 : index
    %c0_34 = arith.constant 0 : index
    %84 = vector.load %arg3[%c0_33, %c0_34] : memref<8x256xf32, #tpu.memory_space<vmem>>, vector<8x256xf32>
    tpu.vector_store %arg3[%c0_33, %c0_34], %83 {strides = array<i32>} : memref<8x256xf32, #tpu.memory_space<vmem>>, vector<8x256xf32>,
    return
  }
  func.func @transform_0(%arg0: i32) -> (i32, i32) {
    %c0_i32 = arith.constant 0 : i32
    %c0_i32_0 = arith.constant 0 : i32
    %c0_i32_1 = arith.constant 0 : i32
    return %c0_i32, %c0_i32_0 : i32, i32
  }
  func.func @transform_1(%arg0: i32) -> (i32, i32) {
    %c0_i32 = arith.constant 0 : i32
    %c0_i32_0 = arith.constant 0 : i32
    return %arg0, %c0_i32 : i32, i32
  }
  func.func @transform_2(%arg0: i32) -> (i32, i32) {
    %c0_i32 = arith.constant 0 : i32
    %c0_i32_0 = arith.constant 0 : i32
    return %arg0, %c0_i32 : i32, i32
  }
}

</mosaic_0001>

<bundles_post_ra>
// kernel: tpu_custom_call.1
= control target key start
LH: loop header
LB: loop body
LE: loop exit
PB: predicated region body
PF: predicated region fallthrough
CT: control target
= control target key end

     0   :  { %7 = vsyncpa [#allocation5], 0  ;;  %s933_s0 = inlined_call_operand.hbm [shape: f32[1,16], index: 0, kind: input, shape index: {}]   ;;  %s934_s1 = inlined_call_operand.hbm [shape: f32[16,4096], index: 1, kind: input, shape index: {}]   ;;  %s935_s2 = inlined_call_operand.hbm [shape: f32[16,256], index: 2, kind: output, shape index: {}]  }
   0x1   :  { %8 = vsyncpa [#allocation3], 0 }
   0x2   :  { %10 = vsyncpa [#allocation3 + $0x1], 0 }
   0x3   :  { %11 = vsyncpa [#allocation4], 0 }
   0x4   :  { %13 = vsyncpa [#allocation4 + $0x1], 0  ;;  %s642_s9 = smov 0   ;;  %s644_s10 = smov 0  }
   0x5   :  { %s646_s11 = smov 0   ;;  %s648_s12 = smov 0  }
   0x6 LB: > { %s663_s13 = sadd.s32 4294967295, %s622_s12   ;;  %s409_s14 = sadd.s32 4294967294, %s622_s12   ;;  %s622_s12 = sphi %s648_s12, %s956_s12   ;;  %s618_s11 = sphi %s646_s11, %s955_s11   ;;  %s614_s10 = sphi %s644_s10, %s954_s10   ;;  %s610_s9 = sphi %s642_s9, %s953_s9  }
   0x7   : > { %p60_p0 = scmp.ne.s32.totalorder %s614_s10, %s610_s9  ;;  %p936_p1 = scmp.eq.s32.totalorder %s663_s13, 0 }
   0x8   : > { %p90_p3 = scmp.eq.s32.totalorder %s409_s14, 1  ;;  %p410_p5 = scmp.ge.s32.totalorder %s622_s12, 1 }
   0x9   : > { %p672_p4 = por %p936_p1, %p60_p0  ;;  %p97_p7 = scmp.lt.s32.totalorder %s622_s12, 3 }
   0xa   : > { %p677_p6 = por %p90_p3, %p60_p0  ;;  %s688_s18 = sadd.s32 1, %s622_s12  }
   0xb   : > { %s939_s15 = scalar_select %p672_p4, 1, 0 }
   0xc   : > { %s940_s16 = scalar_select %p677_p6, 1, 0 }
   0xd   : > { %p682_p8 = pnand %p410_p5, %p97_p7  ;;  %s44_s19 = ssub.s32 %s622_s12, %s688_s18 }
   0xe   : > { %s47_s20 = sadd.s32 1, %s618_s11  ;;  %p701_p12 = scmp.eq.s32.totalorder %s44_s19, 0 }
   0xf   : > { %p452_p10 = pneg %p682_p8  ;;  %p54_p13 = scmp.ne.s32.totalorder %s618_s11, %s614_s10 }
  0x10   : > { %p55_p0 = scmp.eq.s32.totalorder %s622_s12, 0  ;;  %p465_p3 = scmp.lt.s32.totalorder %s622_s12, 2 }
  0x11   : > { %p697_p11 = pnand %p452_p10, %p936_p1  ;;  %s509_s25 = scalar_lea.hbm %s933_s0, 16 }
  0x12   : > { %p510_p5 = scmp.ne.s32.totalorder %s933_s0, %s509_s25  ;;  %p516_p1 = scmp.lt.u32.totalorder %s509_s25, %s933_s0 }
  0x13   : > { %p511_p7 = pneg %p697_p11 }
  0x15   : > { %p512_p10 = pnand %p511_p7, %p510_p5 }
  0x17   : > { %p513_p9 = pneg %p512_p10 }
  0x19   : > { %p518_p2 = pnand %p516_p1, %p513_p9 }
  0x1b   : > { %521 = shalt.err (!%p518_p2)
}
  0x1c   : > { %s624_s30 = smov [#allocation2]   ;;  %p56_p1 = por %p55_p0, %p54_p13 }
  0x1d   : > { %455 = dma.hbm_to_smem (!%p697_p11), %s933_s0, 16, %s624_s30, [#allocation5]  }
  0x1e   : > { %s728_s5 = scalar_select %p701_p12, %s618_s11, %s47_s20  }
  0x1f   : > { %p944_p2 = scmp.eq.s32.totalorder %s663_s13, 1  ;;  %s119_s7 = sand.u32 1, %s618_s11  }
  0x20   : > { %s442_s8 = sshll.u32 %s622_s12, 12  ;;  %s413_s14 = sshll.u32 %s119_s7, 8 }
  0x21   : > { %p740_p9 = por %p944_p2, %p54_p13  ;;  %s749_s23 = scalar_lea.hbm %s934_s1, %s442_s8 }
  0x22   : > { %s123_s20 = scalar_lea.vmem [#allocation6], %s413_s14  ;;  %p753_p11 = pnand %p465_p3, %p56_p1 }
  0x23   : > { %s945_s6 = scalar_select %p740_p9, 1, 0 }
  0x24   : > { %s131_s22 = sshll.u32 %s123_s20, 4  ;;  %s120_s25 = scalar_lea.sflag [#allocation3], %s119_s7  ;;  %s757_s22 = int_to_ptr.vmem [resolvable:$true] %s131_s22 }
  0x25   : > { %s522_s26 = scalar_lea.hbm %s749_s23, 4096  ;;  %p524_p13 = pneg %p753_p11 }
  0x26   : > { %p523_p12 = scmp.ne.s32.totalorder %s749_s23, %s522_s26  ;;  %s527_s29 = scalar_lea.hbm %s934_s1, 8192 }
  0x27   : > { %p528_p3 = scmp.lt.u32.totalorder %s749_s23, %s934_s1  ;;  %p529_p7 = scmp.lt.u32.totalorder %s527_s29, %s522_s26 }
  0x28   : > { %p525_p0 = pnand %p524_p13, %p523_p12  ;;  %p531_p1 = scmp.lt.u32.totalorder %s522_s26, %s749_s23 }
  0x29   : > { %p530_p10 = por %p529_p7, %p528_p3 }
  0x2a   : > { %p526_p5 = pneg %p525_p0 }
  0x2b   : > { %p532_p2 = por %p531_p1, %p530_p10 }
  0x2d   : > { %p533_p6 = pnand %p532_p2, %p526_p5 }
  0x2f   : > { %536 = shalt.err (!%p533_p6)
}
  0x30   : > { %s537_s4 = scalar_lea.vmem %s757_s22, 4096  ;;  %s625_s7 = smov [#allocation6]  }
  0x31   : > { %p538_p12 = scmp.ne.s32.totalorder %s757_s22, %s537_s4  ;;  %s542_s8 = sshll.u32 %s625_s7, 4  ;;  %s543_s8 = int_to_ptr.vmem [resolvable:$false] %s542_s8 }
  0x32   : > { %s544_s14 = scalar_lea.vmem %s543_s8, 8192  ;;  %p545_p4 = scmp.lt.s32.totalorder %s757_s22, %s543_s8 }
  0x33   : > { %p540_p0 = pnand %p538_p12, %p524_p13  ;;  %p546_p3 = scmp.lt.s32.totalorder %s544_s14, %s537_s4 }
  0x35   : > { %p541_p9 = pneg %p540_p0  ;;  %p547_p7 = por %p546_p3, %p545_p4 }
  0x37   : > { %p548_p10 = pnand %p547_p7, %p541_p9 }
  0x39   : > { %551 = shalt.err (!%p548_p10)
}
  0x3a   : > { %459 = dma.hbm_to_vmem [thread:$0]  (!%p753_p11), %s749_s23, 4096, %s757_s22, %s120_s25  }
  0x3b   : > { %140 = sbr.rel (%p682_p8) target bundleno = 145 (0x91), region = 28  ;;  %p947_p6 = scmp.eq.s32.totalorder (!%p682_p8), %s663_s13, 0 }
  0x42   : > { %597 = dma.done.wait (%p947_p6), [#allocation5], 16   ;;  %p948_p13 = pmov %p947_p6 }
  0x43   : > { %s791_s19 = sand.u32 1, %s614_s10   ;;  %p949_p4 = scmp.ne.s32.totalorder %s939_s15, 0 }
  0x44   : > { %599 = vsyncadd (%p948_p13), [#allocation5], 4294967280  ;;  %s418_s21 = sshll.u32 %s791_s19, 8  ;;  %s147_s20 = scalar_lea.sflag [#allocation3], %s791_s19 }
  0x45   : > { %s795_s24 = scalar_lea.vmem [#allocation6], %s418_s21 }
  0x46   : > { %601 = dma.done.wait (%p949_p4), %s147_s20, 4096  }
  0x47   : > { %603 = vsyncadd (%p949_p4), %s147_s20, 4294963200 }
  0x48   : > { %155 = sfence }
  0x49   : > { %s801_s17 = sld [smem:[#allocation2]]  ;;  %s803_s23 = sld [smem:[#allocation2 + $0x1]]  ;;  %v172_v0 = vld [vmem:[%s795_s24] sm:$0xff]  ;;  %v178_v1 = vld [vmem:[%s795_s24 + $0x10] sm:$0xff]  ;;  %v173_v9 = vld [vmem:[%s795_s24 + $0x8] sm:$0xff] }
  0x4a   : > { %s805_s22 = sld [smem:[#allocation2 + $0x2]]  ;;  %s807_s25 = sld [smem:[#allocation2 + $0x3]]  ;;  %v184_v2 = vld [vmem:[%s795_s24 + $0x20] sm:$0xff]  ;;  %v190_v4 = vld [vmem:[%s795_s24 + $0x30] sm:$0xff]  ;;  %v179_v48 = vld [vmem:[%s795_s24 + $0x18] sm:$0xff] }
  0x4b   : > { %s809_s26 = sld [smem:[#allocation2 + $0x4]]  ;;  %s811_s15 = sld [smem:[#allocation2 + $0x5]]  ;;  %v196_v5 = vld [vmem:[%s795_s24 + $0x40] sm:$0xff]  ;;  %v202_v8 = vld [vmem:[%s795_s24 + $0x50] sm:$0xff]  ;;  %v185_v53 = vld [vmem:[%s795_s24 + $0x28] sm:$0xff] }
  0x4c   : > { %s814_s27 = sld [smem:[#allocation2 + $0x6]]  ;;  %s816_s28 = sld [smem:[#allocation2 + $0x7]]  ;;  %v208_v13 = vld [vmem:[%s795_s24 + $0x60] sm:$0xff]  ;;  %v214_v14 = vld [vmem:[%s795_s24 + $0x70] sm:$0xff]  ;;  %v191_v54 = vld [vmem:[%s795_s24 + $0x38] sm:$0xff] }
  0x4d   : > { %s820_s29 = sld [smem:[#allocation2 + $0x8]]  ;;  %s822_s30 = sld [smem:[#allocation2 + $0x9]]  ;;  %v220_v20 = vld [vmem:[%s795_s24 + $0x80] sm:$0xff]  ;;  %v226_v21 = vld [vmem:[%s795_s24 + $0x90] sm:$0xff]  ;;  %v197_v59 = vld [vmem:[%s795_s24 + $0x48] sm:$0xff] }
  0x4e   : > { %s827_s3 = sld [smem:[#allocation2 + $0xa]]  ;;  %s829_s4 = sld [smem:[#allocation2 + $0xb]]  ;;  %v232_v26 = vld [vmem:[%s795_s24 + $0xa0] sm:$0xff]  ;;  %v238_v27 = vld [vmem:[%s795_s24 + $0xb0] sm:$0xff]  ;;  %v203_v60 = vld [vmem:[%s795_s24 + $0x58] sm:$0xff] }
  0x4f   : > { %v175_v3 = vstv %s801_s17  ;;  %v181_v7 = vstv %s803_s23  ;;  %s833_s7 = sld [smem:[#allocation2 + $0xc]]  ;;  %s835_s8 = sld [smem:[#allocation2 + $0xd]]  ;;  %v244_v32 = vld [vmem:[%s795_s24 + $0xc0] sm:$0xff]  ;;  %v250_v33 = vld [vmem:[%s795_s24 + $0xd0] sm:$0xff] }
  0x50   : > { %v176_v6 = vmul.f32 %v175_v3, %v172_v0  ;;  %v182_v10 = vmul.f32 %v181_v7, %v178_v1  ;;  %v187_v11 = vstv %s805_s22  ;;  %v193_v12 = vstv %s807_s25  ;;  %s842_s14 = sld [smem:[#allocation2 + $0xe]]  ;;  %s844_s21 = sld [smem:[#allocation2 + $0xf]]  ;;  %v256_v38 = vld [vmem:[%s795_s24 + $0xe0] sm:$0xff]  ;;  %v262_v39 = vld [vmem:[%s795_s24 + $0xf0] sm:$0xff] }
  0x51   : > { %v846_v15 = vmul.f32 %v175_v3, %v173_v9  ;;  %v188_v16 = vmul.f32 %v187_v11, %v184_v2  ;;  %v194_v17 = vmul.f32 %v193_v12, %v190_v4  ;;  %v199_v18 = vstv %s809_s26  ;;  %v209_v61 = vld [vmem:[%s795_s24 + $0x68] sm:$0xff]  ;;  %v215_v2 = vld [vmem:[%s795_s24 + $0x78] sm:$0xff]  ;;  %s419_s20 = sshll.u32 %s791_s19, 4  ;;  %s443_s23 = sshll.u32 %s663_s13, 8 }
  0x52   : > { %v205_v19 = vstv %s811_s15  ;;  %v200_v22 = vmul.f32 %v199_v18, %v196_v5  ;;  %v211_v24 = vstv %s814_s27  ;;  %v217_v25 = vstv %s816_s28  ;;  %v221_v3 = vld [vmem:[%s795_s24 + $0x88] sm:$0xff]  ;;  %s891_s26 = scalar_lea.hbm %s935_s2, %s443_s23  ;;  %s313_s15 = scalar_lea.sflag [#allocation4], %s791_s19 }
  0x53   : > { %v206_v23 = vmul.f32 %v205_v19, %v202_v8  ;;  %v212_v28 = vmul.f32 %v211_v24, %v208_v13  ;;  %v218_v29 = vmul.f32 %v217_v25, %v214_v14  ;;  %v223_v30 = vstv %s820_s29  ;;  %v227_v4 = vld [vmem:[%s795_s24 + $0x98] sm:$0xff]  ;;  %v245_v14 = vld [vmem:[%s795_s24 + $0xc8] sm:$0xff]  ;;  %p950_p9 = scmp.ne.s32.totalorder %s945_s6, 0  ;;  %s626_s28 = smov [#allocation7]  }
  0x54   : > { %v229_v31 = vstv %s822_s30  ;;  %v224_v34 = vmul.f32 %v223_v30, %v220_v20  ;;  %v235_v36 = vstv %s827_s3  ;;  %v241_v37 = vstv %s829_s4  ;;  %v239_v13 = vld [vmem:[%s795_s24 + $0xb8] sm:$0xff]  ;;  %s556_s13 = sshll.u32 %s626_s28, 4  ;;  %s557_s13 = int_to_ptr.vmem [resolvable:$false] %s556_s13 }
  0x55   : > { %v230_v35 = vmul.f32 %v229_v31, %v226_v21  ;;  %v236_v40 = vmul.f32 %v235_v36, %v232_v26  ;;  %v242_v41 = vmul.f32 %v241_v37, %v238_v27  ;;  %v247_v42 = vstv %s833_s7  ;;  %v263_v26 = vld [vmem:[%s795_s24 + $0xf8] sm:$0xff]  ;;  %s558_s29 = scalar_lea.vmem %s557_s13, 512 }
  0x56   : > { %v253_v43 = vstv %s835_s8  ;;  %v248_v44 = vmul.f32 %v247_v42, %v244_v32  ;;  %v259_v46 = vstv %s842_s14  ;;  %v265_v47 = vstv %s844_s21 }
  0x57   : > { %v254_v45 = vmul.f32 %v253_v43, %v250_v33  ;;  %v260_v49 = vmul.f32 %v259_v46, %v256_v38  ;;  %v266_v50 = vmul.f32 %v265_v47, %v262_v39  ;;  %v268_v51 = vadd.f32 %v182_v10, %v176_v6  ;;  %v233_v10 = vld [vmem:[%s795_s24 + $0xa8] sm:$0xff] }
  0x58   : > { %v270_v52 = vadd.f32 %v194_v17, %v188_v16  ;;  %v272_v55 = vadd.f32 %v206_v23, %v200_v22  ;;  %v274_v56 = vadd.f32 %v218_v29, %v212_v28  ;;  %v276_v57 = vadd.f32 %v230_v35, %v224_v34  ;;  %v251_v22 = vld [vmem:[%s795_s24 + $0xd8] sm:$0xff]  ;;  %v257_v23 = vld [vmem:[%s795_s24 + $0xe8] sm:$0xff]  ;;  %s171_s24 = scalar_lea.vmem [#allocation7], %s419_s20 }
  0x59   : > { %v278_v58 = vadd.f32 %v242_v41, %v236_v40  ;;  %v280_v62 = vadd.f32 %v254_v45, %v248_v44  ;;  %v282_v63 = vadd.f32 %v266_v50, %v260_v49  ;;  %v183_v1 = vmul.f32 %v181_v7, %v179_v48  ;;  %s327_s17 = sshll.u32 %s171_s24, 4  ;;  %s886_s17 = int_to_ptr.vmem [resolvable:$true] %s327_s17 }
  0x5a   : > { %v284_v0 = vadd.f32 %v270_v52, %v268_v51  ;;  %v286_v5 = vadd.f32 %v274_v56, %v272_v55  ;;  %v189_v8 = vmul.f32 %v187_v11, %v185_v53  ;;  %v195_v9 = vmul.f32 %v193_v12, %v191_v54  ;;  %s552_s27 = scalar_lea.vmem %s886_s17, 256  ;;  %p559_p1 = scmp.lt.s32.totalorder %s886_s17, %s557_s13 }
  0x5b   : > { %v288_v6 = vadd.f32 %v278_v58, %v276_v57  ;;  %v290_v16 = vadd.f32 %v282_v63, %v280_v62  ;;  %v201_v17 = vmul.f32 %v199_v18, %v197_v59  ;;  %v207_v20 = vmul.f32 %v205_v19, %v203_v60  ;;  %p553_p8 = scmp.ne.s32.totalorder %s886_s17, %s552_s27  ;;  %p560_p2 = scmp.lt.s32.totalorder %s558_s29, %s552_s27 }
  0x5c   : > { %v213_v21 = vmul.f32 %v211_v24, %v209_v61  ;;  %v292_v7 = vadd.f32 %v286_v5, %v284_v0  ;;  %v219_v27 = vmul.f32 %v217_v25, %v215_v2  ;;  %v225_v28 = vmul.f32 %v223_v30, %v221_v3 }
  0x5d   : > { %v231_v29 = vmul.f32 %v229_v31, %v227_v4  ;;  %v294_v32 = vadd.f32 %v290_v16, %v288_v6  ;;  %v237_v33 = vmul.f32 %v235_v36, %v233_v10  ;;  %v243_v34 = vmul.f32 %v241_v37, %v239_v13  ;;  %p554_p11 = pnand %p553_p8, %p950_p9  ;;  %p561_p12 = por %p560_p2, %p559_p1 }
  0x5e   : > { %v249_v35 = vmul.f32 %v247_v42, %v245_v14  ;;  %v255_v11 = vmul.f32 %v253_v43, %v251_v22  ;;  %v261_v12 = vmul.f32 %v259_v46, %v257_v23  ;;  %v267_v38 = vmul.f32 %v265_v47, %v263_v26 }
  0x5f   : > { %v269_v39 = vadd.f32 %v183_v1, %v846_v15  ;;  %v296_v40 = vadd.f32 %v294_v32, %v292_v7  ;;  %v271_v18 = vadd.f32 %v195_v9, %v189_v8  ;;  %v273_v19 = vadd.f32 %v207_v20, %v201_v17  ;;  %p555_p5 = pneg %p554_p11 }
  0x60   : > { %v275_v24 = vadd.f32 %v219_v27, %v213_v21  ;;  %v277_v41 = vadd.f32 %v231_v29, %v225_v28  ;;  %v279_v44 = vadd.f32 %v243_v34, %v237_v33  ;;  %v281_v45 = vadd.f32 %v255_v11, %v249_v35 }
  0x61   : > { %v283_v48 = vadd.f32 %v267_v38, %v261_v12  ;;  %v435_v25 = vmul.f32 -1.442695, %v296_v40  ;;  %v285_v30 = vadd.f32 %v271_v18, %v269_v39  ;;  %p562_p0 = pnand %p561_p12, %p555_p5 }
  0x62   : > { %v287_v31 = vadd.f32 %v275_v24, %v273_v19  ;;  %v289_v36 = vadd.f32 %v279_v44, %v277_v41 }
  0x63   : > { %v291_v37 = vadd.f32 %v283_v48, %v281_v45  ;;  %501 = vpow2.f32 %v435_v25 }
  0x64   : > { %v293_v42 = vadd.f32 %v287_v31, %v285_v30 }
  0x65   : > { %v295_v43 = vadd.f32 %v291_v37, %v289_v36 }
  0x67   : > { %v297_v46 = vadd.f32 %v295_v43, %v293_v42 }
  0x69   : > { %v436_v15 = vmul.f32 -1.442695, %v297_v46 }
  0x6b   : > { %503 = vpow2.f32 %v436_v15 }
  0x6d   : > { %v502_v47 = vpop.eup %501 }
  0x6e   : > { %v304_v49 = vadd.f32 1.0, %v502_v47 }
  0x70   : > { %505 = vrcp.f32 %v304_v49 }
  0x75   : > { %v504_v50 = vpop.eup %503 }
  0x76   : > { %v305_v51 = vadd.f32 1.0, %v504_v50 }
  0x78   : > { %507 = vrcp.f32 %v305_v51 }
  0x7a   : > { %v506_v52 = vpop.eup %505 }
  0x7b   : > { %310 = vst [vmem:[%s171_s24] sm:$0xff] %v506_v52 }
  0x82   : > { %v508_v53 = vpop.eup %507 }
  0x83   : > { %311 = vst [vmem:[%s171_s24 + $0x8] sm:$0xff] %v508_v53 }
  0x84   : > { %565 = shalt.err (!%p562_p0)
}
  0x85   : > { %s566_s19 = scalar_lea.hbm %s891_s26, 256  ;;  %s570_s4 = scalar_lea.hbm %s935_s2, 512 }
  0x86   : > { %p567_p3 = scmp.ne.s32.totalorder %s891_s26, %s566_s19  ;;  %p571_p6 = scmp.lt.u32.totalorder %s891_s26, %s935_s2 }
  0x87   : > { %p572_p13 = scmp.lt.u32.totalorder %s570_s4, %s566_s19  ;;  %p574_p8 = scmp.lt.u32.totalorder %s566_s19, %s891_s26 }
  0x88   : > { %p568_p7 = pnand %p567_p3, %p950_p9 }
  0x89   : > { %p573_p4 = por %p572_p13, %p571_p6 }
  0x8a   : > { %p569_p10 = pneg %p568_p7 }
  0x8b   : > { %p575_p11 = por %p574_p8, %p573_p4 }
  0x8d   : > { %p576_p5 = pnand %p575_p11, %p569_p10 }
  0x8f   : > { %579 = shalt.err (!%p576_p5)
}
  0x90   : > { %450 = dma.vmem_to_hbm [thread:$0]  (%p950_p9), %s886_s17, 256, %s891_s26, %s313_s15  }
  0x91 PF: > { %s339_s14 = sand.u32 1, %s610_s9   ;;  %p951_p1 = scmp.ne.s32.totalorder %s940_s16, 0 }
  0x92   : > { %p952_p2 = scmp.ge.s32.totalorder %s622_s12, 2  ;;  %s340_s21 = scalar_lea.sflag [#allocation4], %s339_s14 }
  0x94   : > { %p461_p12 = pnand %p952_p2, %p951_p1 }
  0x96   : > { %605 = dma.done.wait (!%p461_p12), %s340_s21, 256  }
  0x97   : > { %607 = vsyncadd (!%p461_p12), %s340_s21, 4294967040  ;;  %p16_p0 = scmp.ge.s32.totalorder %s688_s18, 4   ;;  %s953_s9 = smov %s614_s10 }
  0x98   : > { %s954_s10 = smov %s618_s11  ;;  %s955_s11 = smov %s728_s5 }
  0x99   : > { %s956_s12 = smov %s688_s18  ;;  %18 = sbr.rel (!%p16_p0) target bundleno = 6 (0x6), region = 78 }
  0xa0   :  { %345 = vsyncpa [#allocation3], 1 }
  0xa1   :  { %347 = vsyncpa [#allocation3 + $0x1], 1 }
  0xa2   :  { %348 = vsyncpa [#allocation4], 1 }
  0xa3   :  { %350 = vsyncpa [#allocation4 + $0x1], 1 }
  0xa4   :  { %351 = vsyncpa [#allocation5], 1 }
  0xa5   :  { %353 = vsyncpa [#allocation5 + $0x1], 1 }

</bundles_post_ra>
